<compile_context>
chip_gen: v7x
topology: tpu7x:2x2x1
jax: 0.10.0
libtpu: 0.0.40
codegen_flags: <defaults>
</compile_context>

<pallas_src>
import functools

import jax
import jax.numpy as jnp
from jax import lax
from jax.experimental import pallas as pl
from jax.experimental.pallas import tpu as pltpu

EPS = 1e-5


def _largest_divisor_leq(n, cap):
    for d in range(min(n, cap), 0, -1):
        if n % d == 0:
            return d
    return 1


# ---------------------------------------------------------------------------
# Kernel 1: row-tiled GEMM + bias (the 2x2 / stride-2 transposed conv is
# exactly one GEMM per input pixel producing its 4 output taps).
# ---------------------------------------------------------------------------
def _gemm_bias_kernel(a_ref, b_ref, bias_ref, o_ref):
    o_ref[...] = (
        jnp.dot(a_ref[...], b_ref[...], preferred_element_type=jnp.float32)
        + bias_ref[...]
    )


def gemm_bias(a, b, bias_row, *, row_cap=512):
    M, K = a.shape
    N = b.shape[1]
    tm = _largest_divisor_leq(M, row_cap)
    return pl.pallas_call(
        _gemm_bias_kernel,
        out_shape=jax.ShapeDtypeStruct((M, N), jnp.float32),
        grid=(M // tm,),
        in_specs=[
            pl.BlockSpec((tm, K), lambda i: (i, 0)),
            pl.BlockSpec((K, N), lambda i: (0, 0)),
            pl.BlockSpec((1, N), lambda i: (0, 0)),
        ],
        out_specs=pl.BlockSpec((tm, N), lambda i: (i, 0)),
        compiler_params=pltpu.CompilerParams(dimension_semantics=("parallel",)),
    )(a, b, bias_row)


# ---------------------------------------------------------------------------
# Kernel 2: conv1 (3x3, pad=1) over the *implicit* concat([up, skip]) with
# per-channel batch statistics accumulated in-kernel.  The haloed row windows
# of the two pre-padded sources overlap between grid steps, so they are
# fetched with manual DMA from HBM (memory_space=pl.ANY inputs).
# ---------------------------------------------------------------------------
def _conv1_kernel(up_hbm, sk_hbm, w1u_ref, w1s_ref,
                  y_ref, s_ref, sq_ref,
                  ubuf, sbuf, sums, sqs, sems,
                  *, th, wout, cu, cs, cout):
    n = pl.program_id(0)
    i = pl.program_id(1)

    cp_u = pltpu.make_async_copy(up_hbm.at[n, pl.ds(i * th, th + 2)], ubuf, sems.at[0])
    cp_s = pltpu.make_async_copy(sk_hbm.at[n, pl.ds(i * th, th + 2)], sbuf, sems.at[1])
    cp_u.start()
    cp_s.start()

    @pl.when(jnp.logical_and(n == 0, i == 0))
    def _():
        sums[...] = jnp.zeros_like(sums)
        sqs[...] = jnp.zeros_like(sqs)

    cp_u.wait()
    cp_s.wait()

    acc = jnp.zeros((th * wout, cout), jnp.float32)
    for kh in range(3):
        for kw in range(3):
            t = kh * 3 + kw
            pu = ubuf[kh:kh + th, kw:kw + wout, :].reshape(th * wout, cu)
            ps = sbuf[kh:kh + th, kw:kw + wout, :].reshape(th * wout, cs)
            acc = acc + jnp.dot(pu, w1u_ref[t * cu:(t + 1) * cu, :],
                                preferred_element_type=jnp.float32)
            acc = acc + jnp.dot(ps, w1s_ref[t * cs:(t + 1) * cs, :],
                                preferred_element_type=jnp.float32)

    y_ref[0] = acc.reshape(th, wout, cout)
    sums[...] += jnp.sum(acc, axis=0, keepdims=True)
    sqs[...] += jnp.sum(acc * acc, axis=0, keepdims=True)
    s_ref[...] = sums[...]
    sq_ref[...] = sqs[...]


def conv1_fused(up_p, skip_p, w1u, w1s, th):
    N, HP, WP, CU = up_p.shape
    CS = skip_p.shape[-1]
    HOUT, WOUT = HP - 2, WP - 2
    COUT = w1u.shape[1]
    G = HOUT // th
    kernel = functools.partial(_conv1_kernel, th=th, wout=WOUT, cu=CU, cs=CS, cout=COUT)
    return pl.pallas_call(
        kernel,
        out_shape=(
            jax.ShapeDtypeStruct((N, HOUT, WOUT, COUT), jnp.float32),
            jax.ShapeDtypeStruct((1, COUT), jnp.float32),
            jax.ShapeDtypeStruct((1, COUT), jnp.float32),
        ),
        grid=(N, G),
        in_specs=[
            pl.BlockSpec(memory_space=pl.ANY),
            pl.BlockSpec(memory_space=pl.ANY),
            pl.BlockSpec((9 * CU, COUT), lambda n, i: (0, 0)),
            pl.BlockSpec((9 * CS, COUT), lambda n, i: (0, 0)),
        ],
        out_specs=(
            pl.BlockSpec((1, th, WOUT, COUT), lambda n, i: (n, i, 0, 0)),
            pl.BlockSpec((1, COUT), lambda n, i: (0, 0)),
            pl.BlockSpec((1, COUT), lambda n, i: (0, 0)),
        ),
        scratch_shapes=[
            pltpu.VMEM((th + 2, WP, CU), jnp.float32),
            pltpu.VMEM((th + 2, WP, CS), jnp.float32),
            pltpu.VMEM((1, COUT), jnp.float32),
            pltpu.VMEM((1, COUT), jnp.float32),
            pltpu.SemaphoreType.DMA((2,)),
        ],
        compiler_params=pltpu.CompilerParams(
            dimension_semantics=("arbitrary", "arbitrary")),
    )(up_p, skip_p, w1u, w1s)


# ---------------------------------------------------------------------------
# Kernel 3: conv2 (3x3, pad=1) with the previous block's BN+ReLU applied as a
# fused prologue (single scale/shift) on the haloed input tile, plus in-kernel
# batch statistics for BN2.  Zero-pad positions are re-masked after the affine
# prologue so conv padding stays exactly zero.
# ---------------------------------------------------------------------------
def _conv2_kernel(y1p_hbm, scale_ref, shift_ref, w2_ref,
                  y_ref, s_ref, sq_ref,
                  zbuf, sums, sqs, sem,
                  *, th, hout, wout, cin, cout):
    n = pl.program_id(0)
    i = pl.program_id(1)

    cp = pltpu.make_async_copy(y1p_hbm.at[n, pl.ds(i * th, th + 2)], zbuf, sem.at[0])
    cp.start()

    @pl.when(jnp.logical_and(n == 0, i == 0))
    def _():
        sums[...] = jnp.zeros_like(sums)
        sqs[...] = jnp.zeros_like(sqs)

    cp.wait()

    z = zbuf[...]                                            # (th+2, wout+2, cin)
    z = jnp.maximum(z * scale_ref[...] + shift_ref[...], 0.0)
    prow = i * th + lax.broadcasted_iota(jnp.int32, (th + 2, wout + 2, 1), 0)
    pcol = lax.broadcasted_iota(jnp.int32, (th + 2, wout + 2, 1), 1)
    interior = (prow >= 1) & (prow <= hout) & (pcol >= 1) & (pcol <= wout)
    z = jnp.where(interior, z, 0.0)

    acc = jnp.zeros((th * wout, cout), jnp.float32)
    for kh in range(3):
        for kw in range(3):
            t = kh * 3 + kw
            p = z[kh:kh + th, kw:kw + wout, :].reshape(th * wout, cin)
            acc = acc + jnp.dot(p, w2_ref[t * cin:(t + 1) * cin, :],
                                preferred_element_type=jnp.float32)

    y_ref[0] = acc.reshape(th, wout, cout)
    sums[...] += jnp.sum(acc, axis=0, keepdims=True)
    sqs[...] += jnp.sum(acc * acc, axis=0, keepdims=True)
    s_ref[...] = sums[...]
    sq_ref[...] = sqs[...]


def conv2_fused(y1_p, scale, shift, w2, th):
    N, HP, WP, CIN = y1_p.shape
    HOUT, WOUT = HP - 2, WP - 2
    COUT = w2.shape[1]
    G = HOUT // th
    kernel = functools.partial(_conv2_kernel, th=th, hout=HOUT, wout=WOUT,
                               cin=CIN, cout=COUT)
    return pl.pallas_call(
        kernel,
        out_shape=(
            jax.ShapeDtypeStruct((N, HOUT, WOUT, COUT), jnp.float32),
            jax.ShapeDtypeStruct((1, COUT), jnp.float32),
            jax.ShapeDtypeStruct((1, COUT), jnp.float32),
        ),
        grid=(N, G),
        in_specs=[
            pl.BlockSpec(memory_space=pl.ANY),
            pl.BlockSpec((1, CIN), lambda n, i: (0, 0)),
            pl.BlockSpec((1, CIN), lambda n, i: (0, 0)),
            pl.BlockSpec((9 * CIN, COUT), lambda n, i: (0, 0)),
        ],
        out_specs=(
            pl.BlockSpec((1, th, WOUT, COUT), lambda n, i: (n, i, 0, 0)),
            pl.BlockSpec((1, COUT), lambda n, i: (0, 0)),
            pl.BlockSpec((1, COUT), lambda n, i: (0, 0)),
        ),
        scratch_shapes=[
            pltpu.VMEM((th + 2, WP, CIN), jnp.float32),
            pltpu.VMEM((1, COUT), jnp.float32),
            pltpu.VMEM((1, COUT), jnp.float32),
            pltpu.SemaphoreType.DMA((1,)),
        ],
        compiler_params=pltpu.CompilerParams(
            dimension_semantics=("arbitrary", "arbitrary")),
    )(y1_p, scale, shift, w2)


# ---------------------------------------------------------------------------
# Kernel 4: final BN2 + ReLU (scale/shift pre-folded on host).
# ---------------------------------------------------------------------------
def _bn_relu_kernel(y_ref, scale_ref, shift_ref, o_ref):
    o_ref[...] = jnp.maximum(y_ref[...] * scale_ref[...] + shift_ref[...], 0.0)


def bn_relu_apply(y, scale, shift, th):
    N, H, W, C = y.shape
    G = H // th
    return pl.pallas_call(
        _bn_relu_kernel,
        out_shape=jax.ShapeDtypeStruct((N, H, W, C), jnp.float32),
        grid=(N, G),
        in_specs=[
            pl.BlockSpec((1, th, W, C), lambda n, i: (n, i, 0, 0)),
            pl.BlockSpec((1, C), lambda n, i: (0, 0)),
            pl.BlockSpec((1, C), lambda n, i: (0, 0)),
        ],
        out_specs=pl.BlockSpec((1, th, W, C), lambda n, i: (n, i, 0, 0)),
        compiler_params=pltpu.CompilerParams(
            dimension_semantics=("parallel", "parallel")),
    )(y, scale, shift)


# ------------------------------- glue (JAX) --------------------------------
def _bn_scale_shift(s, sq, count, gamma, beta):
    mean = s / count
    var = jnp.maximum(sq / count - mean * mean, 0.0)   # clamp: avoid NaN rsqrt
    invstd = lax.rsqrt(var + EPS)
    scale = gamma.reshape(1, -1) * invstd
    shift = beta.reshape(1, -1) - mean * scale
    return scale, shift


def decoder_forward(params, inputs_nchw, skip_nchw, row_cap=8):
    x = jnp.transpose(inputs_nchw, (0, 2, 3, 1)).astype(jnp.float32)
    skip = jnp.transpose(skip_nchw, (0, 2, 3, 1)).astype(jnp.float32)
    N, H, W, Cin = x.shape
    Cu = params["up_w"].shape[1]
    Cs = skip.shape[-1]
    Cout = params["w1"].shape[0]
    HOUT, WOUT = 2 * H, 2 * W

    # ---- transposed conv (k=2, s=2) as one row-tiled GEMM ----
    wup = jnp.transpose(params["up_w"], (0, 2, 3, 1)).reshape(Cin, 4 * Cu)
    bup = jnp.tile(params["up_b"], 4).reshape(1, 4 * Cu)
    up = gemm_bias(x.reshape(N * H * W, Cin), wup, bup)
    up = (up.reshape(N, H, W, 2, 2, Cu)
            .transpose(0, 1, 3, 2, 4, 5)
            .reshape(N, HOUT, WOUT, Cu))
    # TODO(synk): fold this 2x2 interleave + zero-pad into the upsample kernel's
    # output path (interleaved out_spec) to drop one XLA copy of `up`.
    up_p = jnp.pad(up, ((0, 0), (1, 1), (1, 1), (0, 0)))
    skip_p = jnp.pad(skip, ((0, 0), (1, 1), (1, 1), (0, 0)))

    th = _largest_divisor_leq(HOUT, row_cap)
    cnt = N * HOUT * WOUT

    # ---- conv1 over implicit concat([up, skip]) + fused batch stats ----
    w1 = params["w1"]                                          # (Cout, Cu+Cs, 3, 3)
    w1u = jnp.transpose(w1[:, :Cu], (2, 3, 1, 0)).reshape(9 * Cu, Cout)
    w1s = jnp.transpose(w1[:, Cu:], (2, 3, 1, 0)).reshape(9 * Cs, Cout)
    y1, s1, sq1 = conv1_fused(up_p, skip_p, w1u, w1s, th)
    scale1, shift1 = _bn_scale_shift(s1, sq1, cnt, params["g1"], params["b1"])

    # ---- conv2 with BN1+ReLU fused as a prologue + fused batch stats ----
    y1_p = jnp.pad(y1, ((0, 0), (1, 1), (1, 1), (0, 0)))
    w2 = jnp.transpose(params["w2"], (2, 3, 1, 0)).reshape(9 * Cout, Cout)
    y2, s2, sq2 = conv2_fused(y1_p, scale1, shift1, w2, th)
    scale2, shift2 = _bn_scale_shift(s2, sq2, cnt, params["g2"], params["b2"])

    # ---- final BN2 + ReLU ----
    out = bn_relu_apply(y2, scale2, shift2, th)
    return jnp.transpose(out, (0, 3, 1, 2))


# --------------------------- pure-JAX reference -----------------------------
def _reference(params, inputs_nchw, skip_nchw):
    x = jnp.transpose(inputs_nchw, (0, 2, 3, 1))
    skip = jnp.transpose(skip_nchw, (0, 2, 3, 1))
    up = jnp.einsum("nhwi,iokl->nhkwlo", x, params["up_w"])
    N, H, _, W, _, O = up.shape
    up = up.reshape(N, 2 * H, 2 * W, O) + params["up_b"]
    xc = jnp.concatenate([up, skip], axis=-1)

    def block(z, w, g, b):
        y = lax.conv_general_dilated(
            z, jnp.transpose(w, (2, 3, 1, 0)), (1, 1), ((1, 1), (1, 1)),
            dimension_numbers=("NHWC", "HWIO", "NHWC"))
        mu = y.mean(axis=(0, 1, 2))
        var = y.var(axis=(0, 1, 2))
        yn = (y - mu) / jnp.sqrt(var + EPS) * g + b
        return jnp.maximum(yn, 0.0)

    h = block(xc, params["w1"], params["g1"], params["b1"])
    h = block(h, params["w2"], params["g2"], params["b2"])
    return jnp.transpose(h, (0, 3, 1, 2))


# ----------------------------------- main ------------------------------------
if __name__ == "__main__":
    in_channels, out_channels = 8, 4
    N, H, W = 2, 8, 8  # low-res input; skip is (N, out_channels, 2H, 2W)

    key = jax.random.PRNGKey(0)
    ks = jax.random.split(key, 6)
    params = {
        "up_w": 0.1 * jax.random.normal(ks[0], (in_channels, out_channels, 2, 2), jnp.float32),
        "up_b": 0.1 * jax.random.normal(ks[1], (out_channels,), jnp.float32),
        "w1":   0.1 * jax.random.normal(ks[2], (out_channels, 2 * out_channels, 3, 3), jnp.float32),
        "g1":   jnp.ones((out_channels,), jnp.float32),
        "b1":   jnp.zeros((out_channels,), jnp.float32),
        "w2":   0.1 * jax.random.normal(ks[3], (out_channels, out_channels, 3, 3), jnp.float32),
        "g2":   jnp.ones((out_channels,), jnp.float32),
        "b2":   jnp.zeros((out_channels,), jnp.float32),
    }

    inputs = jax.random.normal(ks[4], (N, in_channels, H, W), jnp.float32)          # NCHW
    skip = jax.random.normal(ks[5], (N, out_channels, 2 * H, 2 * W), jnp.float32)   # NCHW

    out = jax.block_until_ready(decoder_forward(params, inputs, skip, row_cap=8))
    ref = jax.block_until_ready(_reference(params, inputs, skip))

    assert out.shape == (N, out_channels, 2 * H, 2 * W), out.shape
    err = float(jnp.max(jnp.abs(out - ref)))
    assert jnp.allclose(out, ref, rtol=1e-4, atol=1e-4), err
    print("KERNEL_OK")
</pallas_src>

<mosaic_0001>
module attributes {stable_mosaic.version = 11 : i64} {
  func.func @_gemm_bias_kernel(%arg0: i32, %arg1: memref<128x8xf32, #tpu.memory_space<vmem>>, %arg2: memref<8x16xf32, #tpu.memory_space<vmem>>, %arg3: memref<1x16xf32, #tpu.memory_space<vmem>>, %arg4: memref<128x16xf32, #tpu.memory_space<vmem>>) attributes {dimension_semantics = [#tpu.dimension_semantics<parallel>], iteration_bounds = array<i64: 1>, scalar_prefetch = 0 : i64, scratch_operands = 0 : i64, tpu.core_type = #tpu.core_type<tc>, window_params = [{transform_indices = @transform_0, window_bounds = array<i64: 128, 8>}, {pipeline_mode = #tpu.pipeline_mode<synchronous>, transform_indices = @transform_1, window_bounds = array<i64: 8, 16>}, {pipeline_mode = #tpu.pipeline_mode<synchronous>, transform_indices = @transform_2, window_bounds = array<i64: 1, 16>}, {transform_indices = @transform_3, window_bounds = array<i64: 128, 16>}]} {
    %c0 = arith.constant 0 : index
    %c0_0 = arith.constant 0 : index
    %0 = vector.load %arg1[%c0, %c0_0] : memref<128x8xf32, #tpu.memory_space<vmem>>, vector<128x8xf32>
    %c0_1 = arith.constant 0 : index
    %c0_2 = arith.constant 0 : index
    %1 = vector.load %arg2[%c0_1, %c0_2] : memref<8x16xf32, #tpu.memory_space<vmem>>, vector<8x16xf32>
    %cst = arith.constant dense<0.000000e+00> : vector<128x16xf32>
    %2 = tpu.matmul %0, %1, %cst {dimension_numbers = #tpu.dot_dimension_numbers<[1], [0], [0], [1], [0, 0, 1, 1], [], []>} : vector<128x8xf32>, vector<8x16xf32>, vector<128x16xf32> -> vector<128x16xf32>
    %c0_3 = arith.constant 0 : index
    %c0_4 = arith.constant 0 : index
    %3 = vector.load %arg3[%c0_3, %c0_4] : memref<1x16xf32, #tpu.memory_space<vmem>>, vector<1x16xf32>
    %4 = vector.broadcast %3 : vector<1x16xf32> to vector<128x16xf32>
    %5 = arith.addf %2, %4 : vector<128x16xf32>
    %c0_5 = arith.constant 0 : index
    %c0_6 = arith.constant 0 : index
    %6 = vector.load %arg4[%c0_5, %c0_6] : memref<128x16xf32, #tpu.memory_space<vmem>>, vector<128x16xf32>
    tpu.vector_store %arg4[%c0_5, %c0_6], %5 {strides = array<i32>} : memref<128x16xf32, #tpu.memory_space<vmem>>, vector<128x16xf32>,
    return
  }
  func.func @transform_0(%arg0: i32) -> (i32, i32) {
    %c0_i32 = arith.constant 0 : i32
    %c0_i32_0 = arith.constant 0 : i32
    return %arg0, %c0_i32 : i32, i32
  }
  func.func @transform_1(%arg0: i32) -> (i32, i32) {
    %c0_i32 = arith.constant 0 : i32
    %c0_i32_0 = arith.constant 0 : i32
    %c0_i32_1 = arith.constant 0 : i32
    return %c0_i32, %c0_i32_0 : i32, i32
  }
  func.func @transform_2(%arg0: i32) -> (i32, i32) {
    %c0_i32 = arith.constant 0 : i32
    %c0_i32_0 = arith.constant 0 : i32
    %c0_i32_1 = arith.constant 0 : i32
    return %c0_i32, %c0_i32_0 : i32, i32
  }
  func.func @transform_3(%arg0: i32) -> (i32, i32) {
    %c0_i32 = arith.constant 0 : i32
    %c0_i32_0 = arith.constant 0 : i32
    return %arg0, %c0_i32 : i32, i32
  }
}

</mosaic_0001>

<bundles_post_ra>
// kernel: tpu_custom_call.1
= control target key start
LH: loop header
LB: loop body
LE: loop exit
PB: predicated region body
PF: predicated region fallthrough
CT: control target
= control target key end

     0   :  { %vm38_vm0 = vcmask 64512   ;;  %vm232_vm1 = vcmask 130048   ;;  %s469_s1 = inlined_call_operand.vmem [shape: f32[8,16], index: 1, kind: input, shape index: {}]   ;;  %s470_s0 = inlined_call_operand.vmem [shape: f32[128,8], index: 0, kind: input, shape index: {}]   ;;  %s471_s2 = inlined_call_operand.vmem [shape: f32[1,16], index: 2, kind: input, shape index: {}]   ;;  %s472_s3 = inlined_call_operand.vmem [shape: f32[128,16], index: 3, kind: output, shape index: {}]  }
   0x1   :  { %v30_v0 = vld [vmem:[%s469_s1] sm:$0xff]  ;;  %v15_v3 = vld [vmem:[%s470_s0 + $0x8] sm:$0xff]  ;;  %v16_v5 = vld [vmem:[%s470_s0 + $0x10] sm:$0xff] }
   0x2   :  { %v14_v1 = vld [vmem:[%s470_s0] sm:$0xff]  ;;  %287 = vmatprep.subr.mxu0 %v30_v0  ;;  %313 = vmatprep.subr.mxu1 %v30_v0  ;;  %v23_v4 = vld [vmem:[%s470_s0 + $0x48] sm:$0xff]  ;;  %v24_v6 = vld [vmem:[%s470_s0 + $0x50] sm:$0xff] }
   0x3   :  { %v22_v2 = vld [vmem:[%s470_s0 + $0x40] sm:$0xff]  ;;  %288 = vmatpush3.msra.mxu0 %v30_v0  ;;  %314 = vmatpush3.msra.mxu1 %v30_v0  ;;  %v17_v7 = vld [vmem:[%s470_s0 + $0x18] sm:$0xff]  ;;  %v19_v11 = vld [vmem:[%s470_s0 + $0x28] sm:$0xff] }
   0x4   :  { %289 = vmatprep.mubr.msk.f32.mxu0 %vm38_vm0, %v14_v1  ;;  %301 = vmatprep.mubr.msk.f32.mxu1 %vm38_vm0, %v22_v2  ;;  %v25_v8 = vld [vmem:[%s470_s0 + $0x58] sm:$0xff]  ;;  %v18_v9 = vld [vmem:[%s470_s0 + $0x20] sm:$0xff]  ;;  %v27_v12 = vld [vmem:[%s470_s0 + $0x68] sm:$0xff] }
   0x5   :  { %290 = vmatmul.mubr.msk.f32.vlgmr.msra.gmra.mrb[0].mxu0 %vm38_vm0, %v15_v3  ;;  %302 = vmatmul.mubr.msk.f32.vlgmr.msra.gmra.mrb[0].mxu1 %vm38_vm0, %v23_v4  ;;  %v26_v10 = vld [vmem:[%s470_s0 + $0x60] sm:$0xff]  ;;  %v20_v13 = vld [vmem:[%s470_s0 + $0x30] sm:$0xff]  ;;  %v21_v15 = vld [vmem:[%s470_s0 + $0x38] sm:$0xff] }
   0x6   :  { %292 = vmatprep.mubr.msk.f32.mxu0 %vm38_vm0, %v16_v5  ;;  %304 = vmatprep.mubr.msk.f32.mxu1 %vm38_vm0, %v24_v6  ;;  %v28_v14 = vld [vmem:[%s470_s0 + $0x70] sm:$0xff]  ;;  %v29_v16 = vld [vmem:[%s470_s0 + $0x78] sm:$0xff]  ;;  %v253_v17 = vld [vmem:[%s471_s2] ss:$0 sm:$0xff] }
   0x9   :  { %293 = vmatmul.mubr.msk.f32.gmra.mrb[2].mxu0 %vm38_vm0, %v17_v7  ;;  %305 = vmatmul.mubr.msk.f32.gmra.mrb[2].mxu1 %vm38_vm0, %v25_v8 }
   0xa   :  { %295 = vmatprep.mubr.msk.f32.mxu0 %vm38_vm0, %v18_v9  ;;  %307 = vmatprep.mubr.msk.f32.mxu1 %vm38_vm0, %v26_v10 }
   0xd   :  { %296 = vmatmul.mubr.msk.f32.gmra.mrb[4].mxu0 %vm38_vm0, %v19_v11  ;;  %308 = vmatmul.mubr.msk.f32.gmra.mrb[4].mxu1 %vm38_vm0, %v27_v12 }
   0xe   :  { %298 = vmatprep.mubr.msk.f32.mxu0 %vm38_vm0, %v20_v13  ;;  %310 = vmatprep.mubr.msk.f32.mxu1 %vm38_vm0, %v28_v14 }
  0x11   :  { %299 = vmatmul.mubr.msk.f32.gmra.mrb[6].mxu0 %vm38_vm0, %v21_v15  ;;  %311 = vmatmul.mubr.msk.f32.gmra.mrb[6].mxu1 %vm38_vm0, %v29_v16 }
  0xd8   :  { %v291_v18 = vpop.f32.mrb[0].mxu0  ;;  %v303_v19 = vpop.f32.mrb[0].mxu1 }
  0xd9   :  { %v159_v20 = vadd.f32 %v291_v18, %v253_v17  ;;  %v199_v21 = vadd.f32 %v303_v19, %v253_v17  ;;  %v153_v22 = vpop.f32.mrb[1].mxu0  ;;  %v193_v23 = vpop.f32.mrb[1].mxu1 }
  0xda   :  { %v154_v24 = vadd.f32 %v253_v17, %v153_v22  ;;  %v194_v25 = vadd.f32 %v253_v17, %v193_v23 }
  0xdb   :  { %234 = vst.msk [vmem:[%s472_s3 + $0x8] sm:$0xff] %vm232_vm1, %v159_v20  ;;  %242 = vst.msk [vmem:[%s472_s3 + $0x48] sm:$0xff] %vm232_vm1, %v199_v21 }
  0xdc   :  { %233 = vst.msk [vmem:[%s472_s3] sm:$0xff] %vm232_vm1, %v154_v24  ;;  %241 = vst.msk [vmem:[%s472_s3 + $0x40] sm:$0xff] %vm232_vm1, %v194_v25  ;;  %v294_v26 = vpop.f32.mrb[2].mxu0  ;;  %v306_v27 = vpop.f32.mrb[2].mxu1 }
  0xdd   :  { %v169_v28 = vadd.f32 %v294_v26, %v253_v17  ;;  %v209_v29 = vadd.f32 %v306_v27, %v253_v17  ;;  %v163_v30 = vpop.f32.mrb[3].mxu0  ;;  %v203_v31 = vpop.f32.mrb[3].mxu1 }
  0xde   :  { %v164_v32 = vadd.f32 %v253_v17, %v163_v30  ;;  %v204_v33 = vadd.f32 %v253_v17, %v203_v31 }
  0xdf   :  { %236 = vst.msk [vmem:[%s472_s3 + $0x18] sm:$0xff] %vm232_vm1, %v169_v28  ;;  %244 = vst.msk [vmem:[%s472_s3 + $0x58] sm:$0xff] %vm232_vm1, %v209_v29 }
  0xe0   :  { %235 = vst.msk [vmem:[%s472_s3 + $0x10] sm:$0xff] %vm232_vm1, %v164_v32  ;;  %243 = vst.msk [vmem:[%s472_s3 + $0x50] sm:$0xff] %vm232_vm1, %v204_v33  ;;  %v297_v34 = vpop.f32.mrb[4].mxu0  ;;  %v309_v35 = vpop.f32.mrb[4].mxu1 }
  0xe1   :  { %v179_v36 = vadd.f32 %v297_v34, %v253_v17  ;;  %v219_v37 = vadd.f32 %v309_v35, %v253_v17  ;;  %v173_v38 = vpop.f32.mrb[5].mxu0  ;;  %v213_v39 = vpop.f32.mrb[5].mxu1 }
  0xe2   :  { %v174_v40 = vadd.f32 %v253_v17, %v173_v38  ;;  %v214_v41 = vadd.f32 %v253_v17, %v213_v39 }
  0xe3   :  { %238 = vst.msk [vmem:[%s472_s3 + $0x28] sm:$0xff] %vm232_vm1, %v179_v36  ;;  %246 = vst.msk [vmem:[%s472_s3 + $0x68] sm:$0xff] %vm232_vm1, %v219_v37 }
  0xe4   :  { %237 = vst.msk [vmem:[%s472_s3 + $0x20] sm:$0xff] %vm232_vm1, %v174_v40  ;;  %245 = vst.msk [vmem:[%s472_s3 + $0x60] sm:$0xff] %vm232_vm1, %v214_v41  ;;  %v300_v42 = vpop.f32.mrb[6].mxu0  ;;  %v312_v43 = vpop.f32.mrb[6].mxu1 }
  0xe5   :  { %v189_v44 = vadd.f32 %v300_v42, %v253_v17  ;;  %v229_v45 = vadd.f32 %v312_v43, %v253_v17  ;;  %v183_v46 = vpop.f32.mrb[7].mxu0  ;;  %v223_v47 = vpop.f32.mrb[7].mxu1 }
  0xe6   :  { %v184_v48 = vadd.f32 %v253_v17, %v183_v46  ;;  %v224_v49 = vadd.f32 %v253_v17, %v223_v47 }
  0xe7   :  { %240 = vst.msk [vmem:[%s472_s3 + $0x38] sm:$0xff] %vm232_vm1, %v189_v44  ;;  %248 = vst.msk [vmem:[%s472_s3 + $0x78] sm:$0xff] %vm232_vm1, %v229_v45 }
  0xe8   :  { %239 = vst.msk [vmem:[%s472_s3 + $0x30] sm:$0xff] %vm232_vm1, %v184_v48  ;;  %247 = vst.msk [vmem:[%s472_s3 + $0x70] sm:$0xff] %vm232_vm1, %v224_v49 }

</bundles_post_ra>
